<compile_context>
chip_gen: v7x
topology: tpu7x:2x2x1
jax: 0.10.0
libtpu: 0.0.40
codegen_flags: <defaults>
</compile_context>

<pallas_src>
import jax
import jax.numpy as jnp
from jax.experimental import pallas as pl
from jax.experimental.pallas import tpu as pltpu


LANE_ALIGN = 128  # batch lives on the 128-lane axis -> tiles must be 128-aligned


def _mlp_kernel(xt_ref, w1t_ref, b1t_ref, w2t_ref, b2t_ref, w3t_ref, b3t_ref, ot_ref):
    # All activations are (features, batch_tile): batch on the lane axis (dense).
    # Layer 1: Linear (bf16 MXU, f32 accumulate) -> bf16 bias + ReLU. Dropout = identity.
    h = jnp.dot(w1t_ref[...], xt_ref[...], preferred_element_type=jnp.float32)
    h = jnp.maximum(h.astype(jnp.bfloat16) + b1t_ref[...], 0)

    # Layer 2: Linear -> bf16 bias + ReLU. Dropout = identity.
    h = jnp.dot(w2t_ref[...], h, preferred_element_type=jnp.float32)
    h = jnp.maximum(h.astype(jnp.bfloat16) + b2t_ref[...], 0)

    # Layer 3: Linear -> Sigmoid (kept in f32; sigmoid lowers to the EUP).
    logits = jnp.dot(w3t_ref[...], h, preferred_element_type=jnp.float32) + b3t_ref[...]
    ot_ref[...] = jax.nn.sigmoid(logits).astype(ot_ref.dtype)


def _round_up(n, m):
    return ((n + m - 1) // m) * m


def _choose_tiling(B, block_batch, min_tiles=2):
    """Pick (TB, B_pad, n_tiles) so padding waste stays small and the grid has
    >=2 steps when the batch allows it (keeps both v7x TensorCores busy)."""
    B_al = _round_up(B, LANE_ALIGN)
    bb = max(block_batch, LANE_ALIGN)
    n = max(1, -(-B_al // bb))
    if n < min_tiles and B_al >= min_tiles * LANE_ALIGN:
        n = min_tiles
    TB = _round_up(-(-B_al // n), LANE_ALIGN)
    B_pad = n * TB
    return TB, B_pad, n


def performance_predictor_forward(x, params, *, block_batch=16384):
    """x: (B, input_dim) float32. params: dict of w1,b1,w2,b2,w3,b3 (f32).

    Returns (B, 8) float32 probabilities, matching the PyTorch module in eval mode
    (bf16 input/weight quantization is the only intentional numeric deviation).
    """
    w1, b1 = params["w1"], params["b1"]
    w2, b2 = params["w2"], params["b2"]
    w3, b3 = params["w3"], params["b3"]
    B, input_dim = x.shape
    h1_dim, h2_dim, out_dim = w1.shape[1], w2.shape[1], w3.shape[1]

    TB, B_pad, n_tiles = _choose_tiling(B, block_batch)
    grid = (n_tiles,)

    # Lane-dense transposed input: (input_dim, B_pad) bf16. Cast + pad + transpose is
    # a single wrapper pass over x (the cast pass was already being paid before).
    xt = jnp.pad(x.astype(jnp.bfloat16), ((0, B_pad - B), (0, 0))).T

    # Transposed weights/biases (tiny; stay VMEM-resident via constant index_maps).
    w1t = w1.T.astype(jnp.bfloat16)
    w2t = w2.T.astype(jnp.bfloat16)
    w3t = w3.T.astype(jnp.bfloat16)
    b1t = jnp.reshape(b1, (-1, 1)).astype(jnp.bfloat16)
    b2t = jnp.reshape(b2, (-1, 1)).astype(jnp.bfloat16)
    b3t = jnp.reshape(b3, (-1, 1)).astype(jnp.float32)

    flops = 2 * B_pad * (input_dim * h1_dim + h1_dim * h2_dim + h2_dim * out_dim)
    bytes_accessed = (
        2 * (xt.size + w1t.size + w2t.size + w3t.size + b1t.size + b2t.size)  # bf16
        + 4 * b3t.size                                                         # f32 bias
        + 4 * out_dim * B_pad                                                  # f32 out
    )

    def _resident(a):
        zeros = (0,) * a.ndim
        return pl.BlockSpec(a.shape, lambda i, _z=zeros: _z)

    out_t = pl.pallas_call(
        _mlp_kernel,
        out_shape=jax.ShapeDtypeStruct((out_dim, B_pad), jnp.float32),
        grid=grid,
        in_specs=[
            pl.BlockSpec((input_dim, TB), lambda i: (0, i)),   # lane-dense x tile
            _resident(w1t), _resident(b1t),
            _resident(w2t), _resident(b2t),
            _resident(w3t), _resident(b3t),
        ],
        out_specs=pl.BlockSpec((out_dim, TB), lambda i: (0, i)),  # lane-dense output
        compiler_params=pltpu.CompilerParams(
            dimension_semantics=("parallel",),   # batch tiles shard across v7x's 2 TCs
            vmem_limit_bytes=48 << 20,           # ample on v5e/v6e, under v7x's 64 MiB
        ),
        cost_estimate=pl.CostEstimate(
            flops=int(flops),
            transcendentals=int(B_pad * out_dim),
            bytes_accessed=int(bytes_accessed),
        ),
    )(xt, w1t, b1t, w2t, b2t, w3t, b3t)

    # (out_dim, B_pad) -> (B, out_dim); the output is tiny (8 x B), so this transpose
    # costs one small extra pass and keeps the kernel's stores/writeback fully dense.
    return out_t[:, :B].T


def init_params(key, input_dim, hidden_dim=64):
    """Deterministic PyTorch-style uniform(-1/sqrt(fan_in), 1/sqrt(fan_in)) init."""
    def linear(k, fan_in, fan_out):
        kw, kb = jax.random.split(k)
        bound = 1.0 / jnp.sqrt(fan_in)
        w = jax.random.uniform(kw, (fan_in, fan_out), jnp.float32, -bound, bound)
        b = jax.random.uniform(kb, (1, fan_out), jnp.float32, -bound, bound)
        return w, b

    k1, k2, k3 = jax.random.split(key, 3)
    w1, b1 = linear(k1, input_dim, hidden_dim)
    w2, b2 = linear(k2, hidden_dim, hidden_dim // 2)
    w3, b3 = linear(k3, hidden_dim // 2, 8)
    return {"w1": w1, "b1": b1, "w2": w2, "b2": b2, "w3": w3, "b3": b3}


def reference_forward(x, params):
    """Pure-JAX reference mirroring the kernel's bf16 quantization / bf16 activations."""
    bf = jnp.bfloat16
    h = x.astype(bf)
    h = jnp.dot(h, params["w1"].astype(bf), preferred_element_type=jnp.float32)
    h = jnp.maximum(h.astype(bf) + params["b1"].astype(bf), 0)
    h = jnp.dot(h, params["w2"].astype(bf), preferred_element_type=jnp.float32)
    h = jnp.maximum(h.astype(bf) + params["b2"].astype(bf), 0)
    logits = jnp.dot(h, params["w3"].astype(bf), preferred_element_type=jnp.float32)
    return jax.nn.sigmoid(logits + params["b3"])


if __name__ == "__main__":
    key = jax.random.PRNGKey(0)
    k_x, k_p = jax.random.split(key)

    batch, input_dim, hidden_dim = 4, 32, 64
    x = jax.random.normal(k_x, (batch, input_dim), jnp.float32)
    params = init_params(k_p, input_dim, hidden_dim)

    out = performance_predictor_forward(x, params)
    out = jax.block_until_ready(out)

    ref = reference_forward(x, params)
    assert out.shape == (batch, 8), out.shape
    # bf16 inputs/weights/activations -> looser tolerance than pure-f32.
    assert jnp.allclose(out, ref, atol=1e-2, rtol=1e-2), "mismatch vs reference"

    print("KERNEL_OK")
</pallas_src>

<mosaic_0001>
module attributes {stable_mosaic.version = 11 : i64} {
  func.func @_mlp_kernel(%arg0: i32, %arg1: memref<32x128xbf16, #tpu.memory_space<vmem>>, %arg2: memref<64x32xbf16, #tpu.memory_space<vmem>>, %arg3: memref<64x1xbf16, #tpu.memory_space<vmem>>, %arg4: memref<32x64xbf16, #tpu.memory_space<vmem>>, %arg5: memref<32x1xbf16, #tpu.memory_space<vmem>>, %arg6: memref<8x32xbf16, #tpu.memory_space<vmem>>, %arg7: memref<8x1xf32, #tpu.memory_space<vmem>>, %arg8: memref<8x128xf32, #tpu.memory_space<vmem>>) attributes {dimension_semantics = [#tpu.dimension_semantics<parallel>], iteration_bounds = array<i64: 1>, scalar_prefetch = 0 : i64, scratch_operands = 0 : i64, tpu.core_type = #tpu.core_type<tc>, window_params = [{transform_indices = @transform_0, window_bounds = array<i64: 32, 128>}, {pipeline_mode = #tpu.pipeline_mode<synchronous>, transform_indices = @transform_1, window_bounds = array<i64: 64, 32>}, {pipeline_mode = #tpu.pipeline_mode<synchronous>, transform_indices = @transform_2, window_bounds = array<i64: 64, 1>}, {pipeline_mode = #tpu.pipeline_mode<synchronous>, transform_indices = @transform_3, window_bounds = array<i64: 32, 64>}, {pipeline_mode = #tpu.pipeline_mode<synchronous>, transform_indices = @transform_4, window_bounds = array<i64: 32, 1>}, {pipeline_mode = #tpu.pipeline_mode<synchronous>, transform_indices = @transform_5, window_bounds = array<i64: 8, 32>}, {pipeline_mode = #tpu.pipeline_mode<synchronous>, transform_indices = @transform_6, window_bounds = array<i64: 8, 1>}, {transform_indices = @transform_7, window_bounds = array<i64: 8, 128>}]} {
    %c0 = arith.constant 0 : index
    %c0_0 = arith.constant 0 : index
    %0 = vector.load %arg2[%c0, %c0_0] : memref<64x32xbf16, #tpu.memory_space<vmem>>, vector<64x32xbf16>
    %c0_1 = arith.constant 0 : index
    %c0_2 = arith.constant 0 : index
    %1 = vector.load %arg1[%c0_1, %c0_2] : memref<32x128xbf16, #tpu.memory_space<vmem>>, vector<32x128xbf16>
    %cst = arith.constant dense<0.000000e+00> : vector<64x128xf32>
    %2 = tpu.matmul %0, %1, %cst {dimension_numbers = #tpu.dot_dimension_numbers<[1], [0], [0], [1], [0, 0, 1, 1], [], []>} : vector<64x32xbf16>, vector<32x128xbf16>, vector<64x128xf32> -> vector<64x128xf32>
    %3 = arith.truncf %2 : vector<64x128xf32> to vector<64x128xbf16>
    %c0_3 = arith.constant 0 : index
    %c0_4 = arith.constant 0 : index
    %4 = vector.load %arg3[%c0_3, %c0_4] : memref<64x1xbf16, #tpu.memory_space<vmem>>, vector<64x1xbf16>
    %5 = vector.broadcast %4 : vector<64x1xbf16> to vector<64x128xbf16>
    %6 = arith.addf %3, %5 : vector<64x128xbf16>
    %cst_5 = arith.constant 0.000000e+00 : bf16
    %7 = vector.broadcast %cst_5 : bf16 to vector<64x128xbf16>
    %8 = arith.maximumf %6, %7 : vector<64x128xbf16>
    %c0_6 = arith.constant 0 : index
    %c0_7 = arith.constant 0 : index
    %9 = vector.load %arg4[%c0_6, %c0_7] : memref<32x64xbf16, #tpu.memory_space<vmem>>, vector<32x64xbf16>
    %cst_8 = arith.constant dense<0.000000e+00> : vector<32x128xf32>
    %10 = tpu.matmul %9, %8, %cst_8 {dimension_numbers = #tpu.dot_dimension_numbers<[1], [0], [0], [1], [0, 0, 1, 1], [], []>} : vector<32x64xbf16>, vector<64x128xbf16>, vector<32x128xf32> -> vector<32x128xf32>
    %11 = arith.truncf %10 : vector<32x128xf32> to vector<32x128xbf16>
    %c0_9 = arith.constant 0 : index
    %c0_10 = arith.constant 0 : index
    %12 = vector.load %arg5[%c0_9, %c0_10] : memref<32x1xbf16, #tpu.memory_space<vmem>>, vector<32x1xbf16>
    %13 = vector.broadcast %12 : vector<32x1xbf16> to vector<32x128xbf16>
    %14 = arith.addf %11, %13 : vector<32x128xbf16>
    %cst_11 = arith.constant 0.000000e+00 : bf16
    %15 = vector.broadcast %cst_11 : bf16 to vector<32x128xbf16>
    %16 = arith.maximumf %14, %15 : vector<32x128xbf16>
    %c0_12 = arith.constant 0 : index
    %c0_13 = arith.constant 0 : index
    %17 = vector.load %arg6[%c0_12, %c0_13] : memref<8x32xbf16, #tpu.memory_space<vmem>>, vector<8x32xbf16>
    %cst_14 = arith.constant dense<0.000000e+00> : vector<8x128xf32>
    %18 = tpu.matmul %17, %16, %cst_14 {dimension_numbers = #tpu.dot_dimension_numbers<[1], [0], [0], [1], [0, 0, 1, 1], [], []>} : vector<8x32xbf16>, vector<32x128xbf16>, vector<8x128xf32> -> vector<8x128xf32>
    %c0_15 = arith.constant 0 : index
    %c0_16 = arith.constant 0 : index
    %19 = vector.load %arg7[%c0_15, %c0_16] : memref<8x1xf32, #tpu.memory_space<vmem>>, vector<8x1xf32>
    %20 = vector.broadcast %19 : vector<8x1xf32> to vector<8x128xf32>
    %21 = arith.addf %18, %20 : vector<8x128xf32>
    %22 = arith.negf %21 : vector<8x128xf32>
    %23 = math.exp %22 : vector<8x128xf32>
    %cst_17 = arith.constant 1.000000e+00 : f32
    %24 = vector.broadcast %cst_17 : f32 to vector<8x128xf32>
    %25 = arith.addf %24, %23 : vector<8x128xf32>
    %26 = arith.divf %24, %25 : vector<8x128xf32>
    %c0_18 = arith.constant 0 : index
    %c0_19 = arith.constant 0 : index
    %27 = vector.load %arg8[%c0_18, %c0_19] : memref<8x128xf32, #tpu.memory_space<vmem>>, vector<8x128xf32>
    tpu.vector_store %arg8[%c0_18, %c0_19], %26 {strides = array<i32>} : memref<8x128xf32, #tpu.memory_space<vmem>>, vector<8x128xf32>,
    return
  }
  func.func @transform_0(%arg0: i32) -> (i32, i32) {
    %c0_i32 = arith.constant 0 : i32
    %c0_i32_0 = arith.constant 0 : i32
    return %c0_i32, %arg0 : i32, i32
  }
  func.func @transform_1(%arg0: i32) -> (i32, i32) {
    %c0_i32 = arith.constant 0 : i32
    %c0_i32_0 = arith.constant 0 : i32
    %c0_i32_1 = arith.constant 0 : i32
    return %c0_i32, %c0_i32_0 : i32, i32
  }
  func.func @transform_2(%arg0: i32) -> (i32, i32) {
    %c0_i32 = arith.constant 0 : i32
    %c0_i32_0 = arith.constant 0 : i32
    %c0_i32_1 = arith.constant 0 : i32
    return %c0_i32, %c0_i32_0 : i32, i32
  }
  func.func @transform_3(%arg0: i32) -> (i32, i32) {
    %c0_i32 = arith.constant 0 : i32
    %c0_i32_0 = arith.constant 0 : i32
    %c0_i32_1 = arith.constant 0 : i32
    return %c0_i32, %c0_i32_0 : i32, i32
  }
  func.func @transform_4(%arg0: i32) -> (i32, i32) {
    %c0_i32 = arith.constant 0 : i32
    %c0_i32_0 = arith.constant 0 : i32
    %c0_i32_1 = arith.constant 0 : i32
    return %c0_i32, %c0_i32_0 : i32, i32
  }
  func.func @transform_5(%arg0: i32) -> (i32, i32) {
    %c0_i32 = arith.constant 0 : i32
    %c0_i32_0 = arith.constant 0 : i32
    %c0_i32_1 = arith.constant 0 : i32
    return %c0_i32, %c0_i32_0 : i32, i32
  }
  func.func @transform_6(%arg0: i32) -> (i32, i32) {
    %c0_i32 = arith.constant 0 : i32
    %c0_i32_0 = arith.constant 0 : i32
    %c0_i32_1 = arith.constant 0 : i32
    return %c0_i32, %c0_i32_0 : i32, i32
  }
  func.func @transform_7(%arg0: i32) -> (i32, i32) {
    %c0_i32 = arith.constant 0 : i32
    %c0_i32_0 = arith.constant 0 : i32
    return %c0_i32, %arg0 : i32, i32
  }
}

</mosaic_0001>

<bundles_post_ra>
// kernel: tpu_custom_call.1
= control target key start
LH: loop header
LB: loop body
LE: loop exit
PB: predicated region body
PF: predicated region fallthrough
CT: control target
= control target key end

     0   :  { %vm72_vm0 = vcmask 261120   ;;  %v613_v3 = vmov 0   ;;  %s765_s0 = inlined_call_operand.vmem [shape: bf16[32,128], index: 0, kind: input, shape index: {}]   ;;  %s766_s1 = inlined_call_operand.vmem [shape: bf16[64,32], index: 1, kind: input, shape index: {}]   ;;  %s767_s2 = inlined_call_operand.vmem [shape: bf16[64,1], index: 2, kind: input, shape index: {}]   ;;  %s768_s3 = inlined_call_operand.vmem [shape: bf16[32,64], index: 3, kind: input, shape index: {}]   ;;  %s769_s4 = inlined_call_operand.vmem [shape: bf16[32,1], index: 4, kind: input, shape index: {}]   ;;  %s770_s5 = inlined_call_operand.vmem [shape: bf16[8,32], index: 5, kind: input, shape index: {}]   ;;  %s771_s6 = inlined_call_operand.vmem [shape: f32[8,1], index: 6, kind: input, shape index: {}]   ;;  %s772_s7 = inlined_call_operand.hbm [shape: f32[8,128], index: 7, kind: output, shape index: {}]  }
   0x1   :  { %v577_v0 = vld [vmem:[%s765_s0] sm:$0xff]   ;;  %v578_v1 = vld [vmem:[%s765_s0 + $0x8] sm:$0xff]   ;;  %575 = vset.pattern.permute.xlu0 %v613_v3  ;;  %576 = vset.pattern.permute.xlu1 %v613_v3  ;;  %v581_v7 = vld [vmem:[%s766_s1 + $0x10] sm:$0xff]  }
   0x2   :  { %538 = vmatprep.subr.bf16.mxu0 %v577_v0  ;;  %v579_v2 = vld [vmem:[%s766_s1] sm:$0xff]   ;;  %v580_v4 = vld [vmem:[%s766_s1 + $0x8] sm:$0xff]   ;;  %v158_v10 = vld [vmem:[%s767_s2 + $0x10] sm:$0xf] }
   0x3   :  { %539 = vmatpush3.bf16.msra.mxu0 %v577_v0  ;;  %542 = vmatprep.mubr.msk.bf16.mxu0 %vm72_vm0, %v579_v2  ;;  %v154_v5 = vld [vmem:[%s767_s2] sm:$0xf]  ;;  %v156_v6 = vld [vmem:[%s767_s2 + $0x8] sm:$0xf]  ;;  %v155_v8 = vld [vmem:[%s767_s2 + $0x4] sm:$0xf] }
   0x4   :  { %540 = vmatprep.subr.bf16.mxu0 %v578_v1  ;;  %164 = vperm.xlu0 %575, %v154_v5   ;;  %v157_v9 = vld [vmem:[%s767_s2 + $0xc] sm:$0xf] }
   0x5   :  { %188 = vperm.xlu1 %576, %v156_v6  }
   0x7   :  { %541 = vmatpush3.bf16.msra.mxu0 %v578_v1 }
   0x8   :  { %176 = vperm.xlu0 %575, %v155_v8  }
   0x9   :  { %200 = vperm.xlu1 %576, %v157_v9  }
   0xa   :  { %543 = vmatmul.mubr.msk.bf16.vlgmr.msra.gmra.mrb[0].mxu0 %vm72_vm0, %v580_v4 }
   0xb   :  { %546 = vmatprep.mubr.msk.bf16.mxu0 %vm72_vm0, %v581_v7 }
   0xc   :  { %12 = vsyncpa [#allocation3], 0  ;;  %v159_v11 = vld [vmem:[%s767_s2 + $0x14] sm:$0xf]  ;;  %v582_v12 = vld [vmem:[%s766_s1 + $0x18] sm:$0xff]   ;;  %212 = vperm.xlu0 %575, %v158_v10   ;;  %vm304_vm1 = vcmask 523264   ;;  %v170_v23 = vlaneseq }
   0xd   :  { %224 = vperm.xlu1 %576, %v159_v11   ;;  %v160_v13 = vld [vmem:[%s767_s2 + $0x18] sm:$0xf]  ;;  %v161_v14 = vld [vmem:[%s767_s2 + $0x1c] sm:$0xf]  ;;  %v362_v15 = vld [vmem:[%s769_s4] sm:$0xf] }
   0xe   :  { %v363_v16 = vld [vmem:[%s769_s4 + $0x4] sm:$0xf]  ;;  %v364_v17 = vld [vmem:[%s769_s4 + $0x8] sm:$0xf]  ;;  %v365_v18 = vld [vmem:[%s769_s4 + $0xc] sm:$0xf] }
   0xf   :  { %v431_v19 = vld [vmem:[%s771_s6] sm:$0xff]  ;;  %v614_v21 = vmov 839922192   ;;  %v171_v27 = vshrl.u32 %v170_v23, 7  ;;  %v584_v4 = vld [vmem:[%s768_s3 + $0x8] sm:$0xff]   ;;  %v615_v5 = vmov 0.0  }
  0x10   :  { %236 = vperm.xlu0 %575, %v160_v13   ;;  %v583_v20 = vld [vmem:[%s768_s3] sm:$0xff]   ;;  %v168_v22 = vunpack.c.l.s4 %v614_v21  ;;  %562 = vmatprep.subr.bf16.mxu0 %v615_v5  ;;  %vm616_vm2 = vmmov 0   ;;  %s617_s15 = smov [#allocation2]  }
  0x11   :  { %248 = vperm.xlu1 %576, %v161_v14   ;;  %558 = vmatprep.mubr.msk.bf16.mxu1 %vm304_vm1, %v583_v20  ;;  %s493_s16 = sshll.u32 %s617_s15, 4  ;;  %s494_s16 = int_to_ptr.vmem [resolvable:$true] %s493_s16 }
  0x12   :  { %547 = vmatmul.mubr.msk.bf16.gmra.mrb[4].mxu0 %vm72_vm0, %v582_v12  ;;  %v169_v26 = vunpack.c.0.s8 %v168_v22  ;;  %s589_s17 = scalar_lea.vmem %s494_s16, 128  ;;  %p594_p1 = scmp.lt.s32.totalorder %s494_s16, %s494_s16 }
  0x13   :  { %566 = vmatprep.mubr.msk.bf16.mxu0 %vm616_vm2, %v615_v5  ;;  %p590_p0 = scmp.ne.s32.totalorder %s494_s16, %s589_s17  ;;  %p595_p2 = scmp.lt.s32.totalorder %s589_s17, %s589_s17 }
  0x14   :  { %368 = vperm.xlu0 %575, %v362_v15   ;;  %v725_v30 = vsub.s32 %v169_v26, %v171_v27  ;;  %v430_v26 = vld [vmem:[%s770_s5] sm:$0xf] }
  0x15   :  { %380 = vperm.xlu1 %576, %v363_v16   ;;  %p596_p3 = por %p595_p2, %p594_p1 }
  0x17   :  { %p597_p4 = pnand %p596_p3, %p590_p0 }
  0x18   :  { %392 = vperm.xlu0 %575, %v364_v17  }
  0x19   :  { %404 = vperm.xlu1 %576, %v365_v18  }
  0x1c   :  { %434 = vperm.xlu0 %575, %v431_v19  }
  0x83   :  { %v165_v24 = vpop.permute.xlu0 %164 }
  0x84   :  { %v189_v25 = vpop.permute.xlu1 %188  ;;  %v173_v33 = vrot.slane %v165_v24, %v725_v30 }
  0x85   :  { %v197_v31 = vrot.slane %v189_v25, %v725_v30 }
  0x87   :  { %v177_v28 = vpop.permute.xlu0 %176 }
  0x88   :  { %v201_v29 = vpop.permute.xlu1 %200  ;;  %v185_v34 = vrot.slane %v177_v28, %v725_v30 }
  0x89   :  { %v209_v32 = vrot.slane %v201_v29, %v725_v30 }
  0x8a   :  { %v511_v43 = vcombine.low %v173_v33, %v185_v34 }
  0x8b   :  { %v213_v35 = vpop.permute.xlu0 %212  ;;  %v512_v39 = vcombine.low %v197_v31, %v209_v32 }
  0x8c   :  { %v225_v37 = vpop.permute.xlu1 %224  ;;  %v221_v47 = vrot.slane %v213_v35, %v725_v30 }
  0x8d   :  { %v233_v50 = vrot.slane %v225_v37, %v725_v30 }
  0x8f   :  { %v237_v48 = vpop.permute.xlu0 %236  ;;  %v513_v60 = vcombine.low %v221_v47, %v233_v50 }
  0x90   :  { %v249_v49 = vpop.permute.xlu1 %248  ;;  %v245_v51 = vrot.slane %v237_v48, %v725_v30 }
  0x91   :  { %v257_v52 = vrot.slane %v249_v49, %v725_v30 }
  0x93   :  { %v514_v61 = vcombine.low %v245_v51, %v257_v52  ;;  %v369_v7 = vpop.permute.xlu0 %368 }
  0x94   :  { %v381_v6 = vpop.permute.xlu1 %380  ;;  %v377_v12 = vrot.slane %v369_v7, %v725_v30 }
  0x95   :  { %v389_v13 = vrot.slane %v381_v6, %v725_v30 }
  0x97   :  { %v393_v9 = vpop.permute.xlu0 %392  ;;  %v519_v20 = vcombine.low %v377_v12, %v389_v13 }
  0x98   :  { %v405_v8 = vpop.permute.xlu1 %404  ;;  %v401_v10 = vrot.slane %v393_v9, %v725_v30 }
  0x99   :  { %v413_v11 = vrot.slane %v405_v8, %v725_v30 }
  0x9b   :  { %v520_v17 = vcombine.low %v401_v10, %v413_v11  ;;  %v435_v27 = vpop.permute.xlu0 %434 }
  0xdd   :  { %v544_v36 = vpop.f32.mrb[0].mxu0 }
  0xde   :  { %v119_v38 = vpop.f32.mrb[1].mxu0 }
  0xdf   :  { %v545_v40 = vpop.f32.mrb[2].mxu0 }
  0xe0   :  { %v151_v41 = vpack.c.bf16 %v545_v40, %v544_v36  ;;  %v122_v42 = vpop.f32.mrb[3].mxu0 }
  0xe1   :  { %v150_v44 = vpack.c.bf16 %v122_v42, %v119_v38 }
  0xe2   :  { %v283_v45 = vadd.bf16 %v512_v39, %v151_v41 }
  0xe3   :  { %v282_v46 = vadd.bf16 %v511_v43, %v150_v44 }
  0xe4   :  { %v287_v57 = vmax.bf16 %v613_v3, %v283_v45 }
  0xe5   :  { %v548_v53 = vpop.f32.mrb[4].mxu0  ;;  %v286_v54 = vmax.bf16 %v613_v3, %v282_v46 }
  0xe6   :  { %v135_v55 = vpop.f32.mrb[5].mxu0 }
  0xe7   :  { %v549_v56 = vpop.f32.mrb[6].mxu0  ;;  %550 = vmatprep.subr.bf16.mxu1 %v286_v54 }
  0xe8   :  { %v153_v58 = vpack.c.bf16 %v549_v56, %v548_v53  ;;  %v138_v59 = vpop.f32.mrb[7].mxu0  ;;  %551 = vmatpush3.bf16.msra.mxu1 %v286_v54 }
  0xe9   :  { %v152_v62 = vpack.c.bf16 %v138_v59, %v135_v55  ;;  %552 = vmatprep.subr.bf16.mxu1 %v287_v57 }
  0xea   :  { %v285_v63 = vadd.bf16 %v514_v61, %v153_v58 }
  0xeb   :  { %v284_v0 = vadd.bf16 %v513_v60, %v152_v62 }
  0xec   :  { %553 = vmatpush3.bf16.msra.mxu1 %v287_v57  ;;  %v289_v2 = vmax.bf16 %v613_v3, %v285_v63 }
  0xed   :  { %v288_v1 = vmax.bf16 %v613_v3, %v284_v0 }
  0xef   :  { %554 = vmatprep.subr.bf16.mxu1 %v288_v1 }
  0xf0   :  { %555 = vmatpush3.bf16.msra.mxu1 %v288_v1 }
  0xf1   :  { %556 = vmatprep.subr.bf16.mxu1 %v289_v2 }
  0xf4   :  { %557 = vmatpush3.bf16.msra.mxu1 %v289_v2 }
  0xf7   :  { %559 = vmatmul.mubr.msk.bf16.vlgmr.msra.gmra.mrb[0].mxu1 %vm304_vm1, %v584_v4 }
 0x1ca   :  { %v560_v14 = vpop.f32.mrb[0].mxu1 }
 0x1cb   :  { %v345_v15 = vpop.f32.mrb[1].mxu1 }
 0x1cc   :  { %v561_v16 = vpop.f32.mrb[2].mxu1 }
 0x1cd   :  { %v361_v18 = vpack.c.bf16 %v561_v16, %v560_v14  ;;  %v348_v19 = vpop.f32.mrb[3].mxu1 }
 0x1ce   :  { %v360_v21 = vpack.c.bf16 %v348_v19, %v345_v15 }
 0x1cf   :  { %v427_v22 = vadd.bf16 %v520_v17, %v361_v18 }
 0x1d0   :  { %v426_v23 = vadd.bf16 %v519_v20, %v360_v21 }
 0x1d1   :  { %v429_v25 = vmax.bf16 %v613_v3, %v427_v22 }
 0x1d2   :  { %v428_v24 = vmax.bf16 %v613_v3, %v426_v23 }
 0x1d4   :  { %563 = vmatpush3.bf16.msra.mxu0 %v428_v24 }
 0x1d5   :  { %564 = vmatprep.subr.bf16.mxu0 %v615_v5 }
 0x1d8   :  { %565 = vmatpush3.bf16.msra.mxu0 %v429_v25 }
 0x1db   :  { %567 = vmatmul.mubr.msk.bf16.vlgmr.msra.gmra.mrb[8].mxu0 %vm72_vm0, %v430_v26 }
 0x2ae   :  { %v474_v28 = vpop.f32.mrb[8].mxu0 }
 0x2af   :  { %v475_v29 = vadd.f32 %v474_v28, %v435_v27  ;;  %v568_v30 = vpop.f32.mrb[9].mxu0 }
 0x2b0   :  { %v477_v31 = vpop.f32.mrb[10].mxu0 }
 0x2b1   :  { %v522_v32 = vmul.f32 -1.442695, %v475_v29  ;;  %v569_v33 = vpop.f32.mrb[11].mxu0 }
 0x2b3   :  { %585 = vpow2.f32 %v522_v32 }
 0x2bd   :  { %v586_v34 = vpop.eup %585 }
 0x2be   :  { %v483_v35 = vadd.f32 1.0, %v586_v34 }
 0x2c0   :  { %587 = vrcp.f32 %v483_v35 }
 0x2ca   :  { %v588_v3 = vpop.eup %587 }
 0x2cb   :  { %486 = vst [vmem:[#allocation2] sm:$0xff] %v588_v3 }
 0x2cc   :  { %600 = shalt.err (!%p597_p4)
}
 0x2cd   :  { %s601_s19 = scalar_lea.hbm %s772_s7, 128 }
 0x2ce   :  { %p602_p5 = scmp.ne.s32.totalorder %s772_s7, %s601_s19  ;;  %p605_p6 = scmp.lt.u32.totalorder %s601_s19, %s772_s7 }
 0x2d0   :  { %p607_p7 = pnand %p605_p6, %p602_p5 }
 0x2d2   :  { %610 = shalt.err (!%p607_p7)
}
 0x2d3   :  { %496 = dma.vmem_to_hbm [thread:$0]  %s494_s16, 128, %s772_s7, [#allocation3]  }
 0x2d4   :  { %611 = dma.done.wait [#allocation3], 128  }
 0x2d5   :  { %612 = vsyncadd [#allocation3], 4294967168 }
 0x2d6   :  { %500 = vsyncpa [#allocation3], 1 }

</bundles_post_ra>
